<compile_context>
chip_gen: v7x
topology: tpu7x:2x2x1
jax: 0.10.0
libtpu: 0.0.40
codegen_flags: <defaults>
</compile_context>

<pallas_src>
import functools
import math

import jax
import jax.numpy as jnp
from jax import lax
from jax.experimental import pallas as pl
from jax.experimental.pallas import tpu as pltpu


def _round_up(x, m):
    return ((x + m - 1) // m) * m


def _enc_conv_kernel(xm_ref, xt_ref, wt_ref, o_ref, *, tile_frames, stride,
                     n_shift, k_pad):
    """One (batch, frame-tile) step of the strided Conv1d encoder.

    xm_ref: (1, tile_frames, stride)      main chunked waveform tile
    xt_ref: (1, 8, stride)                overlap chunks from the next tile
    wt_ref: (n_filters, k_pad)            zero-padded, pre-transposed weight
    o_ref:  (1, n_filters, tile_frames)   encoder output tile (NCW layout)
    """
    main = xm_ref[0]                              # (TF, S)
    tail = xt_ref[0][: n_shift - 1]               # (n_shift-1, S)
    chunks = jnp.concatenate([main, tail], axis=0)  # (TF + n_shift - 1, S)

    # Polyphase im2col: n_shift (=3) shifted slices concatenated on the lane
    # axis, zero-padded up to the 8-aligned contraction width k_pad (=32).
    pieces = [chunks[i:i + tile_frames] for i in range(n_shift)]
    lane_pad = k_pad - n_shift * stride
    if lane_pad:
        pieces.append(jnp.zeros((tile_frames, lane_pad), dtype=chunks.dtype))
    patches = jnp.concatenate(pieces, axis=1)       # (TF, k_pad)

    # (F, k_pad) x (TF, k_pad)^T -> (F, TF): lane-dense result, stored as-is.
    res = lax.dot_general(
        wt_ref[...], patches,
        dimension_numbers=(((1,), (1,)), ((), ())),
        preferred_element_type=jnp.float32)
    o_ref[0, :, :] = res.astype(o_ref.dtype)


def padder_encoder(x, weight, *, kernel_size=21, upsampling_depth=4,
                   tile_frames=512):
    """x: (B, T) waveform; weight: (kernel_size, n_filters) FreeFB filterbank.

    Returns (B, n_filters, n_frames) — same as PyTorch _Padder(encoder)(x) (NCW).
    """
    stride = kernel_size // 2
    lcm = abs(stride * 2 ** upsampling_depth) // math.gcd(
        stride, 2 ** upsampling_depth)

    B, T = x.shape
    assert weight.shape[0] == kernel_size
    n_filters = weight.shape[-1]

    # Frames the PyTorch module produces: pad to multiple of lcm, then conv.
    rem = T % lcm
    t_lcm = T + (lcm - rem if rem else 0)
    n_frames = (t_lcm - kernel_size) // stride + 1

    # Frame tiling: tile size is a multiple of 128 (lane-dense output stores).
    tf = min(_round_up(tile_frames, 128), _round_up(max(n_frames, 1), 128))
    n_frames_p = _round_up(n_frames, tf)
    n_tiles = n_frames_p // tf

    n_shift = -(-kernel_size // stride)        # chunks touched per frame (= 3)
    assert n_shift - 1 <= 8
    k_pad = _round_up(n_shift * stride, 8)     # 30 -> 32 (8-aligned K)

    # Chunked waveform: one fused zero-pad covers the module's pad-to-lcm,
    # the frame-tile alignment, and a full 8-chunk block of tail headroom.
    n_chunks_p = n_frames_p + 8
    t_big = n_chunks_p * stride
    x_chunks = jnp.pad(x, ((0, 0), (0, t_big - T))).reshape(
        B, n_chunks_p, stride)

    # Zero-pad taps kernel_size -> k_pad and pre-transpose once (tiny).
    w_t = jnp.pad(weight, ((0, k_pad - kernel_size), (0, 0))).T  # (F, k_pad)

    kernel = functools.partial(
        _enc_conv_kernel, tile_frames=tf, stride=stride, n_shift=n_shift,
        k_pad=k_pad)

    itemsize = jnp.dtype(x.dtype).itemsize
    cost = pl.CostEstimate(
        flops=2 * B * n_frames_p * k_pad * n_filters,
        transcendentals=0,
        bytes_accessed=int(
            B * n_frames_p * stride * itemsize            # main waveform pass
            + B * n_tiles * 8 * stride * itemsize         # overlap re-fetch
            + w_t.size * jnp.dtype(w_t.dtype).itemsize    # weights
            + B * n_filters * n_frames_p * itemsize))     # output write

    out_p = pl.pallas_call(
        kernel,
        out_shape=jax.ShapeDtypeStruct((B, n_filters, n_frames_p), x.dtype),
        grid_spec=pltpu.PrefetchScalarGridSpec(
            num_scalar_prefetch=0,
            grid=(B, n_tiles),
            in_specs=[
                # Main tile: chunks [j*tf, (j+1)*tf).
                pl.BlockSpec((1, tf, stride), lambda b, j: (b, j, 0)),
                # Overlap: the first chunks of the next tile, one 8-chunk block.
                pl.BlockSpec((1, 8, stride),
                             lambda b, j: (b, (j + 1) * (tf // 8), 0)),
                # Full (small) weight every step.
                pl.BlockSpec((n_filters, k_pad), lambda b, j: (0, 0)),
            ],
            out_specs=pl.BlockSpec((1, n_filters, tf),
                                   lambda b, j: (b, 0, j)),
        ),
        compiler_params=pltpu.CompilerParams(
            dimension_semantics=("parallel", "parallel"),
            vmem_limit_bytes=32 * 1024 * 1024,
        ),
        cost_estimate=cost,
    )(x_chunks, x_chunks, w_t)

    # Drop the alignment-only frames (they read zero padding / are discarded,
    # matching PyTorch Conv1d frame count on the lcm-padded input).
    return out_p if n_frames_p == n_frames else out_p[:, :, :n_frames]


if __name__ == "__main__":
    # Module defaults: kernel_size=21, upsampling_depth=4  ->  lcm = 80.
    kernel_size = 21
    upsampling_depth = 4
    n_filters = 64
    B, T = 2, 150  # 150 % 80 != 0  ->  padded to 160 inside the wrapper

    key = jax.random.PRNGKey(0)
    kx, kw = jax.random.split(key)
    x = jax.random.normal(kx, (B, T), dtype=jnp.float32)
    # Deterministic synthetic filterbank weights (FreeFB conv weight, (K, F)).
    weight = 0.1 * jax.random.normal(kw, (kernel_size, n_filters),
                                     dtype=jnp.float32)

    out = padder_encoder(
        x, weight, kernel_size=kernel_size, upsampling_depth=upsampling_depth)
    out = jax.block_until_ready(out)

    # Pure-JAX reference (pad-to-lcm + strided conv1d, no bias).
    stride = kernel_size // 2
    lcm = abs(stride * 2 ** upsampling_depth) // math.gcd(
        stride, 2 ** upsampling_depth)
    rem = T % lcm
    xp = jnp.pad(x, ((0, 0), (0, lcm - rem))) if rem else x
    n_frames = (xp.shape[-1] - kernel_size) // stride + 1
    frames = jnp.stack(
        [xp[:, f * stride: f * stride + kernel_size] for f in range(n_frames)],
        axis=1)                                      # (B, n_frames, K)
    ref = jnp.einsum("bfk,kc->bcf", frames, weight)  # (B, F, n_frames)

    assert out.shape == (B, n_filters, n_frames), out.shape
    assert jnp.allclose(out, ref, atol=1e-4, rtol=1e-4)

    print("KERNEL_OK")
</pallas_src>

<mosaic_0001>
module attributes {stable_mosaic.version = 11 : i64} {
  func.func @_enc_conv_kernel(%arg0: i32, %arg1: i32, %arg2: memref<1x128x10xf32, #tpu.memory_space<vmem>>, %arg3: memref<1x8x10xf32, #tpu.memory_space<vmem>>, %arg4: memref<64x32xf32, #tpu.memory_space<vmem>>, %arg5: memref<1x64x128xf32, #tpu.memory_space<vmem>>) attributes {dimension_semantics = [#tpu.dimension_semantics<parallel>, #tpu.dimension_semantics<parallel>], iteration_bounds = array<i64: 2, 1>, scalar_prefetch = 0 : i64, scratch_operands = 0 : i64, tpu.core_type = #tpu.core_type<tc>, window_params = [{transform_indices = @transform_0, window_bounds = array<i64: 1, 128, 10>}, {transform_indices = @transform_1, window_bounds = array<i64: 1, 8, 10>}, {pipeline_mode = #tpu.pipeline_mode<synchronous>, transform_indices = @transform_2, window_bounds = array<i64: 64, 32>}, {transform_indices = @transform_3, window_bounds = array<i64: 1, 64, 128>}]} {
    %c0 = arith.constant 0 : index
    %c0_0 = arith.constant 0 : index
    %c0_1 = arith.constant 0 : index
    %0 = vector.load %arg2[%c0, %c0_0, %c0_1] : memref<1x128x10xf32, #tpu.memory_space<vmem>>, vector<1x128x10xf32>
    %1 = vector.shape_cast %0 : vector<1x128x10xf32> to vector<128x10xf32>
    %c0_2 = arith.constant 0 : index
    %c0_3 = arith.constant 0 : index
    %c0_4 = arith.constant 0 : index
    %2 = vector.load %arg3[%c0_2, %c0_3, %c0_4] : memref<1x8x10xf32, #tpu.memory_space<vmem>>, vector<1x8x10xf32>
    %3 = vector.shape_cast %2 : vector<1x8x10xf32> to vector<8x10xf32>
    %4 = vector.extract_strided_slice %3 {offsets = [0, 0], sizes = [2, 10], strides = [1, 1]} : vector<8x10xf32> to vector<2x10xf32>
    %5 = tpu.concatenate %1, %4 in 0 : vector<128x10xf32>, vector<2x10xf32> -> vector<130x10xf32>
    %6 = vector.extract_strided_slice %5 {offsets = [0, 0], sizes = [128, 10], strides = [1, 1]} : vector<130x10xf32> to vector<128x10xf32>
    %7 = vector.extract_strided_slice %5 {offsets = [1, 0], sizes = [128, 10], strides = [1, 1]} : vector<130x10xf32> to vector<128x10xf32>
    %8 = vector.extract_strided_slice %5 {offsets = [2, 0], sizes = [128, 10], strides = [1, 1]} : vector<130x10xf32> to vector<128x10xf32>
    %cst = arith.constant 0.000000e+00 : f32
    %9 = vector.broadcast %cst : f32 to vector<128x2xf32>
    %10 = tpu.concatenate %6, %7, %8, %9 in 1 : vector<128x10xf32>, vector<128x10xf32>, vector<128x10xf32>, vector<128x2xf32> -> vector<128x32xf32>
    %c0_5 = arith.constant 0 : index
    %c0_6 = arith.constant 0 : index
    %11 = vector.load %arg4[%c0_5, %c0_6] : memref<64x32xf32, #tpu.memory_space<vmem>>, vector<64x32xf32>
    %cst_7 = arith.constant dense<0.000000e+00> : vector<64x128xf32>
    %12 = tpu.matmul %11, %10, %cst_7 {dimension_numbers = #tpu.dot_dimension_numbers<[1], [1], [0], [0], [0, 0, 1, 0], [], []>} : vector<64x32xf32>, vector<128x32xf32>, vector<64x128xf32> -> vector<64x128xf32>
    %c0_8 = arith.constant 0 : index
    %c0_9 = arith.constant 0 : index
    %c0_10 = arith.constant 0 : index
    %13 = vector.load %arg5[%c0_8, %c0_9, %c0_10] : memref<1x64x128xf32, #tpu.memory_space<vmem>>, vector<1x64x128xf32>
    %14 = vector.shape_cast %13 : vector<1x64x128xf32> to vector<64x128xf32>
    %15 = vector.shape_cast %12 : vector<64x128xf32> to vector<1x64x128xf32>
    tpu.vector_store %arg5[%c0_8, %c0_9, %c0_10], %15 {strides = array<i32>} : memref<1x64x128xf32, #tpu.memory_space<vmem>>, vector<1x64x128xf32>,
    return
  }
  func.func @transform_0(%arg0: i32, %arg1: i32) -> (i32, i32, i32) {
    %c0_i32 = arith.constant 0 : i32
    %c0_i32_0 = arith.constant 0 : i32
    return %arg0, %arg1, %c0_i32 : i32, i32, i32
  }
  func.func @transform_1(%arg0: i32, %arg1: i32) -> (i32, i32, i32) {
    %c1_i32 = arith.constant 1 : i32
    %0 = arith.addi %arg1, %c1_i32 : i32
    %c16_i32 = arith.constant 16 : i32
    %1 = arith.muli %0, %c16_i32 : i32
    %c0_i32 = arith.constant 0 : i32
    %c0_i32_0 = arith.constant 0 : i32
    return %arg0, %1, %c0_i32 : i32, i32, i32
  }
  func.func @transform_2(%arg0: i32, %arg1: i32) -> (i32, i32) {
    %c0_i32 = arith.constant 0 : i32
    %c0_i32_0 = arith.constant 0 : i32
    %c0_i32_1 = arith.constant 0 : i32
    return %c0_i32, %c0_i32_0 : i32, i32
  }
  func.func @transform_3(%arg0: i32, %arg1: i32) -> (i32, i32, i32) {
    %c0_i32 = arith.constant 0 : i32
    %c0_i32_0 = arith.constant 0 : i32
    return %arg0, %c0_i32, %arg1 : i32, i32, i32
  }
}

</mosaic_0001>

<bundles_post_ra>
// kernel: tpu_custom_call.1
= control target key start
LH: loop header
LB: loop body
LE: loop exit
PB: predicated region body
PF: predicated region fallthrough
CT: control target
= control target key end

     0   :  { %8 = vsyncpa [#allocation3], 0  ;;  %s1658_s0 = inlined_call_operand.vmem [shape: f32[2,136,10], index: 0, kind: input, shape index: {}]   ;;  %s1659_s1 = inlined_call_operand.vmem [shape: f32[2,136,10], index: 1, kind: input, shape index: {}]   ;;  %s1660_s2 = inlined_call_operand.vmem [shape: f32[64,32], index: 2, kind: input, shape index: {}]   ;;  %s1661_s3 = inlined_call_operand.hbm [shape: f32[2,64,128], index: 3, kind: output, shape index: {}]  }
   0x1   :  { %10 = vsyncpa [#allocation3 + $0x1], 0  ;;  %s1237_s12 = smov 0   ;;  %s1239_s13 = smov 0  }
   0x2   :  { %s1241_s14 = smov 0   ;;  %s1243_s15 = smov 0  }
   0x3   :  { %s1245_s16 = smov 0   ;;  %s1247_s17 = smov 0  }
   0x4 LB: > { %s818_s18 = sadd.s32 4294967295, %s1210_s17   ;;  %s819_s19 = sadd.s32 4294967294, %s1210_s17   ;;  %s1210_s17 = sphi %s1247_s17, %s16_s17   ;;  %s1206_s16 = sphi %s1245_s16, %s1670_s16   ;;  %s1202_s15 = sphi %s1243_s15, %s1669_s15   ;;  %s1198_s14 = sphi %s1241_s14, %s1668_s14   ;;  %s1194_s13 = sphi %s1239_s13, %s1667_s13   ;;  %s1190_s12 = sphi %s1237_s12, %s1666_s12  }
   0x5   : > { %s28_s20 = sadd.s32 1, %s1206_s16  ;;  %s118_s21 = sadd.s32 1, %s1198_s14 }
   0x6   : > { %p30_p0 = scmp.ge.s32.totalorder %s28_s20, 2  ;;  %p128_p1 = scmp.ne.s32.totalorder %s1198_s14, %s1194_s13 }
   0x7   : > { %p129_p2 = scmp.eq.s32.totalorder %s818_s18, 1  ;;  %p134_p3 = scmp.ne.s32.totalorder %s1194_s13, %s1190_s12 }
   0x8   : > { %s1672_s20 = smov (%p30_p0, %s28_s20), 0  ;;  %p135_p5 = scmp.eq.s32.totalorder %s819_s19, 1 }
   0x9   : > { %p1277_p4 = por %p129_p2, %p128_p1  ;;  %s113_s23 = ssub.s32 %s1206_s16, %s1672_s20 }
   0xa   : > { %p822_p6 = scmp.ge.s32.totalorder %s1210_s17, 1  ;;  %p116_p7 = scmp.eq.s32.totalorder %s113_s23, 0 }
   0xb   : > { %p1284_p8 = por %p135_p5, %p134_p3  ;;  %p192_p9 = scmp.lt.s32.totalorder %s1210_s17, 3 }
   0xc   : > { %s1290_s25 = scalar_select %p116_p7, %s1198_s14, %s118_s21  }
   0xd   : > { %p193_p10 = pnand %p822_p6, %p192_p9 }
   0xe   : > { %p239_p11 = scmp.lt.s32.totalorder (!%p193_p10), %s1202_s15, 1  ;;  %vm298_vm0 = vcmask (!%p193_p10), 1046528   ;;  %vm380_vm1 = vcmask (!%p193_p10), 1045504   ;;  %s1212_s4 = smov (!%p193_p10), 10   ;;  %vm521_vm2 = vcmask (!%p193_p10), 261120   ;;  %vm462_vm3 = vcmask (!%p193_p10), 80896  }
   0xf   : > { %196 = sbr.rel (%p193_p10) target bundleno = 454 (0x1c6), region = 32  ;;  %s1213_s5 = smov (!%p193_p10), 20   ;;  %vm479_vm4 = vcmask (!%p193_p10), 162816   ;;  %vm496_vm5 = vcmask (!%p193_p10), 244736   ;;  %vm1459_vm6 = vmpackc.low (!%p193_p10), %vm521_vm2, %vm521_vm2 }
  0x10   : > { %s857_s19 = sshll.u32 (!%p193_p10), %s1202_s15, 10  ;;  %s1214_s28 = smov (!%p193_p10), [#allocation2]  }
  0x11   : > { %s1136_s29 = sshll.u32 (!%p193_p10), %s1214_s28, 4  ;;  %s1137_s29 = int_to_ptr.vmem [resolvable:$false] %s1136_s29 }
  0x16   : > { %s1294_s26 = scalar_select %p239_p11, %s1202_s15, 1 }
  0x18   : > { %s990_s27 = smul.u32 136, %s1294_s26  ;;  %s1610_s26 = scalar_lea.hbm %s1661_s3, %s857_s19 }
  0x1a   : > { %s1302_s30 = scalar_lea.vmem %s1658_s0, %s990_s27  ;;  %s856_s6 = sadd.s32 128, %s990_s27 }
  0x1b   : > { %v1305_v0 = vld [vmem:[%s1302_s30] sm:$0xff]  ;;  %v1308_v1 = vld [vmem:[%s1302_s30 + $0x8] sm:$0xff]  ;;  %v1311_v2 = vld [vmem:[%s1302_s30 + $0x10] sm:$0xff]  ;;  %s261_s9 = scalar_lea.vmem %s1659_s1, %s856_s6 }
  0x1c   : > { %v299_v3 = vrot.slane %v1305_v0, 1  ;;  %v300_v4 = vrot.slane %v1308_v1, 1  ;;  %v302_v5 = vrot.slane %v1311_v2, 1  ;;  %v381_v6 = vrot.slane %v1305_v0, 2  ;;  %v1318_v7 = vld [vmem:[%s1302_s30 + $0x18] sm:$0xff]  ;;  %v1321_v8 = vld [vmem:[%s1302_s30 + $0x20] sm:$0xff] }
  0x1d   : > { %v382_v9 = vrot.slane %v1308_v1, 2  ;;  %v384_v10 = vrot.slane %v1311_v2, 2  ;;  %v304_v11 = vrot.slane %v1318_v7, 1  ;;  %v306_v12 = vrot.slane %v1321_v8, 1  ;;  %v1332_v17 = vld [vmem:[%s1302_s30 + $0x28] sm:$0xff]  ;;  %v1335_v18 = vld [vmem:[%s1302_s30 + $0x30] sm:$0xff] }
  0x1e   : > { %v301_v13 = vsel %vm298_vm0, %v299_v3, %v300_v4  ;;  %v303_v14 = vsel %vm298_vm0, %v300_v4, %v302_v5  ;;  %v386_v15 = vrot.slane %v1318_v7, 2  ;;  %v388_v16 = vrot.slane %v1321_v8, 2  ;;  %v1341_v23 = vld [vmem:[%s1302_s30 + $0x38] sm:$0xff]  ;;  %v1344_v24 = vld [vmem:[%s1302_s30 + $0x40] sm:$0xff]  ;;  %v1360_v39 = vld [vmem:[%s1302_s30 + $0x48] sm:$0xff] }
  0x1f   : > { %v1052_v19 = vpack.i.bf16 %v303_v14, %v301_v13  ;;  %v383_v20 = vsel %vm380_vm1, %v381_v6, %v382_v9  ;;  %v385_v21 = vsel %vm380_vm1, %v382_v9, %v384_v10  ;;  %v305_v22 = vsel %vm298_vm0, %v302_v5, %v304_v11  ;;  %v1363_v40 = vld [vmem:[%s1302_s30 + $0x50] sm:$0xff]  ;;  %v1376_v51 = vld [vmem:[%s1302_s30 + $0x58] sm:$0xff]  ;;  %v1379_v52 = vld [vmem:[%s1302_s30 + $0x60] sm:$0xff] }
  0x20   : > { %v307_v25 = vsel %vm298_vm0, %v304_v11, %v306_v12  ;;  %v387_v26 = vsel %vm380_vm1, %v384_v10, %v386_v15  ;;  %v389_v27 = vsel %vm380_vm1, %v386_v15, %v388_v16  ;;  %v1057_v28 = vpack.i.bf16 %v385_v21, %v383_v20  ;;  %v1394_v63 = vld [vmem:[%s1302_s30 + $0x68] sm:$0xff]  ;;  %v1397_v3 = vld [vmem:[%s1302_s30 + $0x70] sm:$0xff] }
  0x21   : > { %1053 = vrot.lane.b32.xlu0 %v1052_v19, %s1212_s4  ;;  %v1062_v29 = vpack.i.bf16 %v307_v25, %v305_v22  ;;  %v308_v30 = vrot.slane %v1332_v17, 1  ;;  %v310_v31 = vrot.slane %v1335_v18, 1  ;;  %v390_v32 = vrot.slane %v1332_v17, 2  ;;  %v280_v19 = vld [vmem:[%s261_s9] sm:$0xff]  ;;  %s231_s9 = sand.u32 1, %s1194_s13  }
  0x22   : > { %v392_v33 = vrot.slane %v1335_v18, 2  ;;  %v312_v34 = vrot.slane %v1341_v23, 1  ;;  %v314_v35 = vrot.slane %v1344_v24, 1  ;;  %v1067_v36 = vpack.i.bf16 %v389_v27, %v387_v26  ;;  %s823_s10 = sshll.u32 %s231_s9, 6  ;;  %s1612_s15 = scalar_lea.sflag [#allocation3], %s231_s9 }
  0x23   : > { %1063 = vrot.lane.b32.xlu1 %v1062_v29, %s1212_s4  ;;  %v309_v37 = vsel %vm298_vm0, %v306_v12, %v308_v30  ;;  %v311_v38 = vsel %vm298_vm0, %v308_v30, %v310_v31  ;;  %v391_v41 = vsel %vm380_vm1, %v388_v16, %v390_v32  ;;  %v394_v43 = vrot.slane %v1341_v23, 2  ;;  %v1413_v16 = vld [vmem:[%s1302_s30 + $0x78] sm:$0xff]  ;;  %s233_s11 = scalar_lea.vmem [#allocation2], %s823_s10  ;;  %s1138_s30 = scalar_lea.vmem %s1137_s29, 2048 }
  0x24   : > { %v393_v42 = vsel %vm380_vm1, %v390_v32, %v392_v33  ;;  %v396_v44 = vrot.slane %v1344_v24, 2  ;;  %v1072_v45 = vpack.i.bf16 %v311_v38, %v309_v37  ;;  %v313_v46 = vsel %vm298_vm0, %v310_v31, %v312_v34  ;;  %s722_s18 = sshll.u32 %s233_s11, 4  ;;  %s1605_s18 = int_to_ptr.vmem [resolvable:$true] %s722_s18 }
  0x25   : > { %1058 = vrot.lane.b32.xlu0 %v1057_v28, %s1213_s5  ;;  %v315_v47 = vsel %vm298_vm0, %v312_v34, %v314_v35  ;;  %v316_v48 = vrot.slane %v1360_v39, 1  ;;  %v318_v49 = vrot.slane %v1363_v40, 1  ;;  %v1077_v50 = vpack.i.bf16 %v393_v42, %v391_v41  ;;  %s1132_s27 = scalar_lea.vmem %s1605_s18, 1024  ;;  %p1139_p1 = scmp.lt.s32.totalorder %s1605_s18, %s1137_s29 }
  0x26   : > { %v395_v53 = vsel %vm380_vm1, %v392_v33, %v394_v43  ;;  %v397_v54 = vsel %vm380_vm1, %v394_v43, %v396_v44  ;;  %v398_v55 = vrot.slane %v1360_v39, 2  ;;  %v400_v56 = vrot.slane %v1363_v40, 2  ;;  %p1133_p12 = scmp.ne.s32.totalorder %s1605_s18, %s1132_s27  ;;  %p1140_p2 = scmp.lt.s32.totalorder %s1138_s30, %s1132_s27 }
  0x27   : > { %1068 = vrot.lane.b32.xlu1 %v1067_v36, %s1213_s5  ;;  %v1082_v57 = vpack.i.bf16 %v315_v47, %v313_v46  ;;  %v317_v58 = vsel %vm298_vm0, %v314_v35, %v316_v48  ;;  %v319_v59 = vsel %vm298_vm0, %v316_v48, %v318_v49  ;;  %v320_v60 = vrot.slane %v1376_v51, 1  ;;  %v513_v46 = vld [vmem:[%s1660_s2] sm:$0xff] }
  0x28   : > { %v322_v61 = vrot.slane %v1379_v52, 1  ;;  %v1087_v62 = vpack.i.bf16 %v397_v54, %v395_v53  ;;  %v399_v4 = vsel %vm380_vm1, %v396_v44, %v398_v55  ;;  %v401_v5 = vsel %vm380_vm1, %v398_v55, %v400_v56  ;;  %v517_v47 = vld [vmem:[%s1660_s2 + $0x20] sm:$0xff]  ;;  %914 = vmatprep.mubr.msk.f32.mxu0 %vm521_vm2, %v513_v46  ;;  %p1134_p13 = pnand %p1133_p12, %p1277_p4  ;;  %p1141_p3 = por %p1140_p2, %p1139_p1 }
  0x29   : > { %1073 = vrot.lane.b32.xlu0 %v1072_v45, %s1212_s4  ;;  %v402_v6 = vrot.slane %v1376_v51, 2  ;;  %v404_v9 = vrot.slane %v1379_v52, 2  ;;  %v1092_v10 = vpack.i.bf16 %v319_v59, %v317_v58  ;;  %v321_v11 = vsel %vm298_vm0, %v318_v49, %v320_v60  ;;  %920 = vmatprep.mubr.msk.f32.mxu1 %vm521_vm2, %v517_v47 }
  0x2a   : > { %v323_v12 = vsel %vm298_vm0, %v320_v60, %v322_v61  ;;  %v324_v13 = vrot.slane %v1394_v63, 1  ;;  %v326_v14 = vrot.slane %v1397_v3, 1  ;;  %v1097_v15 = vpack.i.bf16 %v401_v5, %v399_v4  ;;  %p1135_p0 = pneg %p1134_p13 }
  0x2b   : > { %1078 = vrot.lane.b32.xlu1 %v1077_v50, %s1213_s5  ;;  %v403_v20 = vsel %vm380_vm1, %v400_v56, %v402_v6  ;;  %v405_v21 = vsel %vm380_vm1, %v402_v6, %v404_v9  ;;  %v406_v22 = vrot.slane %v1394_v63, 2  ;;  %v408_v25 = vrot.slane %v1397_v3, 2 }
  0x2c   : > { %v1102_v26 = vpack.i.bf16 %v323_v12, %v321_v11  ;;  %v325_v27 = vsel %vm298_vm0, %v322_v61, %v324_v13  ;;  %v327_v28 = vsel %vm298_vm0, %v324_v13, %v326_v14  ;;  %v328_v29 = vrot.slane %v1413_v16, 1  ;;  %p1142_p5 = pnand %p1141_p3, %p1135_p0 }
  0x2d   : > { %1083 = vrot.lane.b32.xlu0 %v1082_v57, %s1212_s4  ;;  %v330_v30 = vrot.slane %v280_v19, 1  ;;  %v1107_v31 = vpack.i.bf16 %v405_v21, %v403_v20  ;;  %v407_v32 = vsel %vm380_vm1, %v404_v9, %v406_v22  ;;  %v409_v33 = vsel %vm380_vm1, %v406_v22, %v408_v25 }
  0x2e   : > { %v410_v34 = vrot.slane %v1413_v16, 2  ;;  %v412_v35 = vrot.slane %v280_v19, 2  ;;  %v1112_v36 = vpack.i.bf16 %v327_v28, %v325_v27  ;;  %v329_v37 = vsel %vm298_vm0, %v326_v14, %v328_v29 }
  0x2f   : > { %1088 = vrot.lane.b32.xlu1 %v1087_v62, %s1213_s5  ;;  %v331_v38 = vsel %vm298_vm0, %v328_v29, %v330_v30  ;;  %v1117_v41 = vpack.i.bf16 %v409_v33, %v407_v32 }
  0x30   : > { %v411_v42 = vsel %vm380_vm1, %v408_v25, %v410_v34  ;;  %v413_v43 = vsel %vm380_vm1, %v410_v34, %v412_v35  ;;  %v1122_v44 = vpack.i.bf16 %v331_v38, %v329_v37 }
  0x31   : > { %1093 = vrot.lane.b32.xlu0 %v1092_v10, %s1212_s4  ;;  %v1127_v45 = vpack.i.bf16 %v413_v43, %v411_v42 }
  0x33   : > { %1098 = vrot.lane.b32.xlu1 %v1097_v15, %s1213_s5 }
  0x35   : > { %1103 = vrot.lane.b32.xlu0 %v1102_v26, %s1212_s4 }
  0x37   : > { %1108 = vrot.lane.b32.xlu1 %v1107_v31, %s1213_s5 }
  0x39   : > { %1113 = vrot.lane.b32.xlu0 %v1112_v36, %s1212_s4 }
  0x3b   : > { %1118 = vrot.lane.b32.xlu1 %v1117_v41, %s1213_s5 }
  0x3d   : > { %1123 = vrot.lane.b32.xlu0 %v1122_v44, %s1212_s4 }
  0x3f   : > { %1128 = vrot.lane.b32.xlu1 %v1127_v45, %s1213_s5 }
  0x93   : > { %v1054_v48 = vpop.permute.xlu0 %1053 }
  0x94   : > { %v1056_v49 = vunpack.i.h.bf16 %v1054_v48  ;;  %v1055_v50 = vunpack.i.l.bf16 %v1054_v48 }
  0x95   : > { %v1064_v53 = vpop.permute.xlu1 %1063 }
  0x96   : > { %v1066_v54 = vunpack.i.h.bf16 %v1064_v53  ;;  %v1065_v55 = vunpack.i.l.bf16 %v1064_v53  ;;  %v464_v59 = vsel %vm462_vm3, %v1308_v1, %v1056_v49  ;;  %v463_v60 = vsel %vm462_vm3, %v1305_v0, %v1055_v50  ;;  %v516_v0 = vld [vmem:[%s1660_s2 + $0x18] sm:$0xff] }
  0x97   : > { %v1059_v56 = vpop.permute.xlu0 %1058 }
  0x98   : > { %v1061_v57 = vunpack.i.h.bf16 %v1059_v56  ;;  %v1060_v58 = vunpack.i.l.bf16 %v1059_v56  ;;  %v466_v61 = vsel %vm462_vm3, %v1318_v7, %v1066_v54  ;;  %v465_v62 = vsel %vm462_vm3, %v1311_v2, %v1065_v55 }
  0x99   : > { %v1069_v4 = vpop.permute.xlu1 %1068 }
  0x9a   : > { %v480_v5 = vsel %vm479_vm4, %v463_v60, %v1060_v58  ;;  %v481_v6 = vsel %vm479_vm4, %v464_v59, %v1061_v57  ;;  %v1071_v9 = vunpack.i.h.bf16 %v1069_v4  ;;  %v1070_v10 = vunpack.i.l.bf16 %v1069_v4 }
  0x9b   : > { %v497_v11 = vsel %vm496_vm5, %v480_v5, 0.0  ;;  %v498_v1 = vsel %vm496_vm5, %v481_v6, 0.0  ;;  %v1074_v7 = vpop.permute.xlu0 %1073 }
  0x9c   : > { %v482_v2 = vsel %vm479_vm4, %v465_v62, %v1070_v10  ;;  %v483_v12 = vsel %vm479_vm4, %v466_v61, %v1071_v9  ;;  %v926_v13 = vpack.c.bf16 %v498_v1, %v497_v11  ;;  %v1076_v14 = vunpack.i.h.bf16 %v1074_v7 }
  0x9d   : > { %v499_v15 = vsel %vm496_vm5, %v482_v2, 0.0  ;;  %v500_v19 = vsel %vm496_vm5, %v483_v12, 0.0  ;;  %v1075_v20 = vunpack.i.l.bf16 %v1074_v7  ;;  %v1079_v21 = vpop.permute.xlu1 %1078 }
  0x9e   : > { %928 = vmatprep.subr.msk.bf16.mxu0 %vm1459_vm6, %v926_v13  ;;  %974 = vmatprep.subr.msk.bf16.mxu1 %vm1459_vm6, %v926_v13  ;;  %v932_v22 = vpack.c.bf16 %v500_v19, %v499_v15  ;;  %v468_v25 = vsel %vm462_vm3, %v1332_v17, %v1076_v14  ;;  %v1081_v26 = vunpack.i.h.bf16 %v1079_v21  ;;  %v1080_v27 = vunpack.i.l.bf16 %v1079_v21 }
  0x9f   : > { %931 = vmatpush3.bf16.xpose.msk.msra.mxu0 %vm1459_vm6, %v926_v13  ;;  %982 = vmatpush3.bf16.xpose.msk.msra.mxu1 %vm1459_vm6, %v926_v13  ;;  %v467_v28 = vsel %vm462_vm3, %v1321_v8, %v1075_v20  ;;  %v1084_v29 = vpop.permute.xlu0 %1083 }
  0xa0   : > { %934 = vmatprep.subr.msk.bf16.mxu0 %vm1459_vm6, %v932_v22  ;;  %975 = vmatprep.subr.msk.bf16.mxu1 %vm1459_vm6, %v932_v22  ;;  %v484_v17 = vsel %vm479_vm4, %v467_v28, %v1080_v27  ;;  %v485_v30 = vsel %vm479_vm4, %v468_v25, %v1081_v26  ;;  %v1086_v31 = vunpack.i.h.bf16 %v1084_v29  ;;  %v1085_v32 = vunpack.i.l.bf16 %v1084_v29 }
  0xa1   : > { %v501_v33 = vsel %vm496_vm5, %v484_v17, 0.0  ;;  %v502_v34 = vsel %vm496_vm5, %v485_v30, 0.0  ;;  %v1089_v35 = vpop.permute.xlu1 %1088 }
  0xa2   : > { %v1091_v36 = vunpack.i.h.bf16 %v1089_v35  ;;  %v470_v8 = vsel %vm462_vm3, %v1341_v23, %v1086_v31  ;;  %v469_v37 = vsel %vm462_vm3, %v1335_v18, %v1085_v32  ;;  %v1090_v38 = vunpack.i.l.bf16 %v1089_v35  ;;  %v514_v35 = vld [vmem:[%s1660_s2 + $0x8] sm:$0xff] }
  0xa3   : > { %v938_v41 = vpack.c.bf16 %v502_v34, %v501_v33  ;;  %v1094_v42 = vpop.permute.xlu0 %1093 }
  0xa4   : > { %v486_v43 = vsel %vm479_vm4, %v469_v37, %v1090_v38  ;;  %v487_v44 = vsel %vm479_vm4, %v470_v8, %v1091_v36  ;;  %v1096_v45 = vunpack.i.h.bf16 %v1094_v42  ;;  %v1095_v46 = vunpack.i.l.bf16 %v1094_v42  ;;  %v518_v36 = vld [vmem:[%s1660_s2 + $0x28] sm:$0xff]  ;;  %v515_v8 = vld [vmem:[%s1660_s2 + $0x10] sm:$0xff]  ;;  %v520_v38 = vld [vmem:[%s1660_s2 + $0x38] sm:$0xff] }
  0xa5   : > { %v1099_v47 = vpop.permute.xlu1 %1098  ;;  %v503_v18 = vsel %vm496_vm5, %v486_v43, 0.0  ;;  %v504_v23 = vsel %vm496_vm5, %v487_v44, 0.0  ;;  %v519_v37 = vld [vmem:[%s1660_s2 + $0x30] sm:$0xff] }
  0xa6   : > { %v1101_v48 = vunpack.i.h.bf16 %v1099_v47  ;;  %v1100_v49 = vunpack.i.l.bf16 %v1099_v47  ;;  %v472_v50 = vsel %vm462_vm3, %v1360_v39, %v1096_v45  ;;  %v471_v53 = vsel %vm462_vm3, %v1344_v24, %v1095_v46 }
  0xa7   : > { %937 = vmatpush3.bf16.xpose.msk.msra.mxu0 %vm1459_vm6, %v932_v22  ;;  %983 = vmatpush3.bf16.xpose.msk.msra.mxu1 %vm1459_vm6, %v932_v22  ;;  %v944_v54 = vpack.c.bf16 %v504_v23, %v503_v18  ;;  %v1104_v55 = vpop.permute.xlu0 %1103 }
  0xa8   : > { %940 = vmatprep.subr.msk.bf16.mxu0 %vm1459_vm6, %v938_v41  ;;  %976 = vmatprep.subr.msk.bf16.mxu1 %vm1459_vm6, %v938_v41  ;;  %v488_v56 = vsel %vm479_vm4, %v471_v53, %v1100_v49  ;;  %v489_v57 = vsel %vm479_vm4, %v472_v50, %v1101_v48  ;;  %v1106_v58 = vunpack.i.h.bf16 %v1104_v55  ;;  %v1105_v59 = vunpack.i.l.bf16 %v1104_v55 }
  0xa9   : > { %v1109_v60 = vpop.permute.xlu1 %1108  ;;  %v505_v24 = vsel %vm496_vm5, %v488_v56, 0.0  ;;  %v506_v39 = vsel %vm496_vm5, %v489_v57, 0.0 }
  0xaa   : > { %v1111_v61 = vunpack.i.h.bf16 %v1109_v60  ;;  %v1110_v62 = vunpack.i.l.bf16 %v1109_v60  ;;  %v474_v4 = vsel %vm462_vm3, %v1376_v51, %v1106_v58  ;;  %v473_v5 = vsel %vm462_vm3, %v1363_v40, %v1105_v59 }
  0xab   : > { %v950_v6 = vpack.c.bf16 %v506_v39, %v505_v24  ;;  %v1114_v9 = vpop.permute.xlu0 %1113 }
  0xac   : > { %v490_v10 = vsel %vm479_vm4, %v473_v5, %v1110_v62  ;;  %v491_v11 = vsel %vm479_vm4, %v474_v4, %v1111_v61  ;;  %v1116_v1 = vunpack.i.h.bf16 %v1114_v9  ;;  %v1115_v7 = vunpack.i.l.bf16 %v1114_v9 }
  0xad   : > { %v1119_v2 = vpop.permute.xlu1 %1118  ;;  %v507_v40 = vsel %vm496_vm5, %v490_v10, 0.0  ;;  %v508_v51 = vsel %vm496_vm5, %v491_v11, 0.0 }
  0xae   : > { %v1121_v12 = vunpack.i.h.bf16 %v1119_v2  ;;  %v1120_v13 = vunpack.i.l.bf16 %v1119_v2  ;;  %v476_v14 = vsel %vm462_vm3, %v1394_v63, %v1116_v1  ;;  %v475_v15 = vsel %vm462_vm3, %v1379_v52, %v1115_v7 }
  0xaf   : > { %943 = vmatpush3.bf16.xpose.msk.msra.mxu0 %vm1459_vm6, %v938_v41  ;;  %984 = vmatpush3.bf16.xpose.msk.msra.mxu1 %vm1459_vm6, %v938_v41  ;;  %v956_v19 = vpack.c.bf16 %v508_v51, %v507_v40  ;;  %v1124_v20 = vpop.permute.xlu0 %1123 }
  0xb0   : > { %946 = vmatprep.subr.msk.bf16.mxu0 %vm1459_vm6, %v944_v54  ;;  %977 = vmatprep.subr.msk.bf16.mxu1 %vm1459_vm6, %v944_v54  ;;  %v492_v21 = vsel %vm479_vm4, %v475_v15, %v1120_v13  ;;  %v493_v22 = vsel %vm479_vm4, %v476_v14, %v1121_v12  ;;  %v1126_v25 = vunpack.i.h.bf16 %v1124_v20  ;;  %v1125_v26 = vunpack.i.l.bf16 %v1124_v20 }
  0xb1   : > { %v1129_v27 = vpop.permute.xlu1 %1128  ;;  %v509_v52 = vsel %vm496_vm5, %v492_v21, 0.0  ;;  %v510_v63 = vsel %vm496_vm5, %v493_v22, 0.0 }
  0xb2   : > { %v1131_v28 = vunpack.i.h.bf16 %v1129_v27  ;;  %v1130_v29 = vunpack.i.l.bf16 %v1129_v27  ;;  %v478_v17 = vsel %vm462_vm3, %v1413_v16, %v1126_v25  ;;  %v477_v30 = vsel %vm462_vm3, %v1397_v3, %v1125_v26 }
  0xb3   : > { %v962_v31 = vpack.c.bf16 %v510_v63, %v509_v52 }
  0xb4   : > { %v494_v32 = vsel %vm479_vm4, %v477_v30, %v1130_v29  ;;  %v495_v33 = vsel %vm479_vm4, %v478_v17, %v1131_v28 }
  0xb5   : > { %v511_v16 = vsel %vm496_vm5, %v494_v32, 0.0  ;;  %v512_v3 = vsel %vm496_vm5, %v495_v33, 0.0 }
  0xb6   : > { %v968_v34 = vpack.c.bf16 %v512_v3, %v511_v16 }
  0xb7   : > { %949 = vmatpush3.bf16.xpose.msk.msra.mxu0 %vm1459_vm6, %v944_v54  ;;  %985 = vmatpush3.bf16.xpose.msk.msra.mxu1 %vm1459_vm6, %v944_v54 }
  0xb8   : > { %952 = vmatprep.subr.msk.bf16.mxu0 %vm1459_vm6, %v950_v6  ;;  %978 = vmatprep.subr.msk.bf16.mxu1 %vm1459_vm6, %v950_v6 }
  0xbf   : > { %955 = vmatpush3.bf16.xpose.msk.msra.mxu0 %vm1459_vm6, %v950_v6  ;;  %986 = vmatpush3.bf16.xpose.msk.msra.mxu1 %vm1459_vm6, %v950_v6 }
  0xc0   : > { %958 = vmatprep.subr.msk.bf16.mxu0 %vm1459_vm6, %v956_v19  ;;  %979 = vmatprep.subr.msk.bf16.mxu1 %vm1459_vm6, %v956_v19 }
  0xc7   : > { %961 = vmatpush3.bf16.xpose.msk.msra.mxu0 %vm1459_vm6, %v956_v19  ;;  %987 = vmatpush3.bf16.xpose.msk.msra.mxu1 %vm1459_vm6, %v956_v19 }
  0xc8   : > { %964 = vmatprep.subr.msk.bf16.mxu0 %vm1459_vm6, %v962_v31  ;;  %980 = vmatprep.subr.msk.bf16.mxu1 %vm1459_vm6, %v962_v31 }
  0xcf   : > { %967 = vmatpush3.bf16.xpose.msk.msra.mxu0 %vm1459_vm6, %v962_v31  ;;  %988 = vmatpush3.bf16.xpose.msk.msra.mxu1 %vm1459_vm6, %v962_v31 }
  0xd0   : > { %970 = vmatprep.subr.msk.bf16.mxu0 %vm1459_vm6, %v968_v34  ;;  %981 = vmatprep.subr.msk.bf16.mxu1 %vm1459_vm6, %v968_v34 }
  0xd7   : > { %973 = vmatpush3.bf16.xpose.msk.msra.mxu0 %vm1459_vm6, %v968_v34  ;;  %989 = vmatpush3.bf16.xpose.msk.msra.mxu1 %vm1459_vm6, %v968_v34 }
  0xde   : > { %915 = vmatmul.mubr.msk.f32.vlgmr.msra.gmra.mrb[0].mxu0 %vm521_vm2, %v514_v35  ;;  %921 = vmatmul.mubr.msk.f32.vlgmr.msra.gmra.mrb[0].mxu1 %vm521_vm2, %v518_v36 }
  0xdf   : > { %917 = vmatprep.mubr.msk.f32.mxu0 %vm521_vm2, %v515_v8  ;;  %923 = vmatprep.mubr.msk.f32.mxu1 %vm521_vm2, %v519_v37 }
  0xe2   : > { %918 = vmatmul.mubr.msk.f32.gmra.mrb[2].mxu0 %vm521_vm2, %v516_v0  ;;  %924 = vmatmul.mubr.msk.f32.gmra.mrb[2].mxu1 %vm521_vm2, %v520_v38 }
 0x1b1   : > { %v916_v41 = vpop.f32.mrb[0].mxu0  ;;  %v922_v42 = vpop.f32.mrb[0].mxu1 }
 0x1b2   : > { %700 = vst [vmem:[%s233_s11 + $0x8] sm:$0xff] %v916_v41  ;;  %704 = vst [vmem:[%s233_s11 + $0x28] sm:$0xff] %v922_v42  ;;  %v660_v43 = vpop.f32.mrb[1].mxu0  ;;  %v680_v44 = vpop.f32.mrb[1].mxu1 }
 0x1b3   : > { %699 = vst [vmem:[%s233_s11] sm:$0xff] %v660_v43  ;;  %703 = vst [vmem:[%s233_s11 + $0x20] sm:$0xff] %v680_v44 }
 0x1b5   : > { %v919_v45 = vpop.f32.mrb[2].mxu0  ;;  %v925_v46 = vpop.f32.mrb[2].mxu1 }
 0x1b6   : > { %702 = vst [vmem:[%s233_s11 + $0x18] sm:$0xff] %v919_v45  ;;  %706 = vst [vmem:[%s233_s11 + $0x38] sm:$0xff] %v925_v46  ;;  %v670_v47 = vpop.f32.mrb[3].mxu0  ;;  %v690_v18 = vpop.f32.mrb[3].mxu1 }
 0x1b7   : > { %701 = vst [vmem:[%s233_s11 + $0x10] sm:$0xff] %v670_v47  ;;  %705 = vst [vmem:[%s233_s11 + $0x30] sm:$0xff] %v690_v18 }
 0x1b8   : > { %1145 = shalt.err (!%p1142_p5)
}
 0x1b9   : > { %s1146_s4 = scalar_lea.hbm %s1610_s26, 1024  ;;  %s1150_s7 = scalar_lea.hbm %s1661_s3, 2048 }
 0x1ba   : > { %p1147_p6 = scmp.ne.s32.totalorder %s1610_s26, %s1146_s4  ;;  %p1151_p10 = scmp.lt.u32.totalorder %s1610_s26, %s1661_s3 }
 0x1bb   : > { %p1152_p11 = scmp.lt.u32.totalorder %s1150_s7, %s1146_s4  ;;  %p1154_p13 = scmp.lt.u32.totalorder %s1146_s4, %s1610_s26 }
 0x1bc   : > { %p1148_p7 = pnand %p1147_p6, %p1277_p4 }
 0x1bd   : > { %p1153_p12 = por %p1152_p11, %p1151_p10 }
 0x1be   : > { %p1149_p9 = pneg %p1148_p7 }
 0x1bf   : > { %p1155_p0 = por %p1154_p13, %p1153_p12 }
 0x1c1   : > { %p1156_p1 = pnand %p1155_p0, %p1149_p9 }
 0x1c3   : > { %1159 = shalt.err (!%p1156_p1)
}
 0x1c4   : > { %s1215_s10 = smov 128   ;;  %s1216_s11 = smov 8  }
 0x1c5   : > { %992 = dma.vmem_to_hbm [thread:$0]  (%p1277_p4), %s1605_s18, 1024, %s1610_s26, %s1612_s15, %s1215_s10, %s1215_s10, %s1216_s11  }
 0x1c6 PF: > { %p999_p2 = scmp.ge.s32.totalorder %s1210_s17, 2  ;;  %s737_s19 = sand.u32 1, %s1190_s12  }
 0x1c7   : > { %s738_s21 = scalar_lea.sflag [#allocation3], %s737_s19 }
 0x1c8   : > { %p995_p3 = pnand %p999_p2, %p1284_p8 }
 0x1ca   : > { %1185 = dma.done.wait (!%p995_p3), %s738_s21, 1024  }
 0x1cb   : > { %1187 = vsyncadd (!%p995_p3), %s738_s21, 4294966272  ;;  %s16_s17 = sadd.s32 1, %s1210_s17   ;;  %s1666_s12 = smov %s1194_s13 }
 0x1cc   : > { %p13_p5 = scmp.ge.s32.totalorder %s16_s17, 4   ;;  %s1667_s13 = smov %s1198_s14 }
 0x1cd   : > { %s1668_s14 = smov %s1290_s25  ;;  %s1669_s15 = smov %s1206_s16 }
 0x1ce   : > { %s1670_s16 = smov %s1672_s20  ;;  %15 = sbr.rel (!%p13_p5) target bundleno = 4 (0x4), region = 70 }
 0x1d5   :  { %743 = vsyncpa [#allocation3], 1 }
 0x1d6   :  { %745 = vsyncpa [#allocation3 + $0x1], 1 }

</bundles_post_ra>
